<compile_context>
chip_gen: v6e
topology: v6e:2x2x1
jax: 0.10.0
libtpu: 0.0.40
codegen_flags: <defaults>
</compile_context>

<pallas_src>
import jax
import jax.numpy as jnp
from jax import lax
from jax.experimental import pallas as pl
from jax.experimental.pallas import tpu as pltpu

N_OPS = 5
NEG_PAD = -1e30  # stands in for -inf padding of the max-pool


def _mixed_op_kernel(scal_ref, x_ref, pmat_ref, tmat_ref, bias_ref, out_ref):
    Nb, Hp2, WpC = x_ref.shape          # (Nb, H+2, (W+2)*C_in)
    H = Hp2 - 2
    WCo = out_ref.shape[2]              # W * C_out (== 128 here: lane-dense stores)
    WCi = pmat_ref.shape[0]             # W * C_in
    Cin = (WpC - WCi) // 2
    M = Nb * H                          # matmul M dimension (batch folded into rows)

    x = x_ref[...]                      # zero-padded f32 slab

    # Positions that were zero padding in the original image, built ONCE on the
    # padded slab; used to rebuild the -inf border of the max pool.
    rid = lax.broadcasted_iota(jnp.int32, (Hp2, WpC), 0)
    lid = lax.broadcasted_iota(jnp.int32, (Hp2, WpC), 1)
    pad = (rid == 0) | (rid == Hp2 - 1) | (lid < Cin) | (lid >= WpC - Cin)
    x_neg = jnp.where(pad[None], NEG_PAD, x)

    g_skip = scal_ref[0]
    g_avg = scal_ref[1]                 # already contains the 1/9
    g_max = scal_ref[2]
    do_conv = scal_ref[3] > 0.0

    # --- single fused pass over the 9 stencil taps --------------------------
    avg_sum = None
    mx = None
    skip = None
    for dh in range(3):
        xs = x[:, dh:dh + H, :]
        xn = x_neg[:, dh:dh + H, :]
        for dw in range(3):
            t = xs[:, :, dw * Cin:dw * Cin + WCi]          # (Nb, H, W*C_in)
            avg_sum = t if avg_sum is None else avg_sum + t
            tn = xn[:, :, dw * Cin:dw * Cin + WCi]
            mx = tn if mx is None else jnp.maximum(mx, tn)
            if dh == 1 and dw == 1:
                skip = t                                   # identity branch

    # skip + avg + max, weighted, then one block-diagonal projection matmul.
    mix = (g_skip * skip + g_avg * avg_sum + g_max * mx).reshape(M, WCi)
    y = jnp.dot(mix.astype(jnp.bfloat16), pmat_ref[...],
                preferred_element_type=jnp.float32)
    out_ref[...] = (y + bias_ref[...]).reshape(Nb, H, WCo).astype(out_ref.dtype)

    # --- relu -> conv3x3 -> BN -> proj, folded into 3 Toeplitz matmuls ------
    @pl.when(do_conv)
    def _():
        acc = None
        for dh in range(3):
            s = jnp.maximum(x[:, dh:dh + H, :], 0.0).reshape(M, WpC)
            d = jnp.dot(s.astype(jnp.bfloat16), tmat_ref[dh],
                        preferred_element_type=jnp.float32)
            acc = d if acc is None else acc + d
        out_ref[...] = out_ref[...] + acc.reshape(Nb, H, WCo).astype(out_ref.dtype)


def _pick_nb(N, H, target_rows=128):
    """Batch sub-axis per block: aim for matmul M = Nb*H >= ~128."""
    nb = max(1, min(N, target_rows // max(H, 1)))
    # keep >= 2 parallel grid steps (v7x megacore) when that still leaves M >= 64
    if N // nb < 2 and N >= 2 and (N // 2) * H >= 64:
        nb = max(1, N // 2)
    while N % nb:
        nb -= 1
    return nb


@jax.jit
def mixed_op_pallas(x_nchw, weights, wconv_hwio, conv_bn_scale, conv_bn_bias,
                    proj_w, proj_scale, proj_bias):
    """MixedOp.forward.  `weights` is flattened (== weights.view(-1))."""
    f32 = jnp.float32
    bf16 = jnp.bfloat16
    alphas = weights.reshape(-1).astype(f32)
    assert alphas.shape[0] == N_OPS
    N, C_in, H, W = x_nchw.shape
    C_out = proj_w.shape[1]
    WpC = (W + 2) * C_in
    WCi = W * C_in
    WCo = W * C_out

    Nb = _pick_nb(N, H)
    nN = N // Nb

    # gated architecture weights (op 0 'none' contributes exactly zero)
    g = jnp.where(alphas > 0.001, alphas, 0.0)
    scal = jnp.stack([g[1], g[2] / 9.0, g[3], g[4]]).astype(f32)   # SMEM scalars

    # 1x1 proj with its BN scale folded in; block-diagonal over lane-packed rows.
    Pe = proj_w.astype(f32) * proj_scale.astype(f32)[None, :]      # (C_in, C_out)
    eyeW = jnp.eye(W, dtype=f32)
    Pmat = jnp.einsum('uv,io->uivo', eyeW, Pe).reshape(WCi, WCo).astype(bf16)

    # 3x3 conv weights folded with conv-BN scale, alpha_4 and the projection,
    # laid out as 3 Toeplitz blocks (one per kernel row) acting on a lane-packed
    # ((W+2)*C_in) padded row slab.  Stored bf16 (default matmul is bf16 anyway).
    Mfold = g[4] * (conv_bn_scale.astype(f32)[:, None] * Pe)       # (C_in, C_out)
    Wf = jnp.einsum('hwij,jo->hwio', wconv_hwio.astype(f32), Mfold)
    c_idx = jnp.arange(W + 2)[:, None]
    v_idx = jnp.arange(W)[None, :]
    t_rows = []
    for dh in range(3):
        T = jnp.zeros((W + 2, C_in, W, C_out), f32)
        for dw in range(3):
            sel = (c_idx == v_idx + dw).astype(f32)                # (W+2, W)
            T = T + jnp.einsum('cv,io->civo', sel, Wf[dh, dw])
        t_rows.append(T.reshape(WpC, WCo))
    Tmat = jnp.stack(t_rows, axis=0).astype(bf16)                  # (3, (W+2)*C_in, W*C_out)

    # conv-BN bias routed through the projection, plus proj-BN bias
    bias = g[4] * (conv_bn_bias.astype(f32) @ Pe) + proj_bias.astype(f32)
    bias_row = jnp.tile(bias, W).reshape(1, WCo)

    # single zero-padded NHWC slab, lane-packed as (W+2)*C_in (NO halo gather)
    x = jnp.transpose(x_nchw, (0, 2, 3, 1)).astype(f32)
    xz = jnp.pad(x, ((0, 0), (1, 1), (1, 1), (0, 0))).reshape(N, H + 2, WpC)

    out = pl.pallas_call(
        _mixed_op_kernel,
        out_shape=jax.ShapeDtypeStruct((N, H, WCo), f32),
        grid=(nN,),
        in_specs=[
            pl.BlockSpec(memory_space=pltpu.MemorySpace.SMEM),               # gated alphas
            pl.BlockSpec((Nb, H + 2, WpC), lambda n: (n, 0, 0)),             # padded input slab
            pl.BlockSpec((WCi, WCo), lambda n: (0, 0)),                      # proj (block diag), bf16
            pl.BlockSpec((3, WpC, WCo), lambda n: (0, 0, 0)),                # folded conv3x3, bf16
            pl.BlockSpec((1, WCo), lambda n: (0, 0)),                        # folded bias
        ],
        out_specs=pl.BlockSpec((Nb, H, WCo), lambda n: (n, 0, 0)),
        compiler_params=pltpu.CompilerParams(
            dimension_semantics=("parallel",),
            # v7x-safe; can be raised toward ~100 MiB on v5e/v6e for bigger blocks
            vmem_limit_bytes=32 * 1024 * 1024),
    )(scal, xz, Pmat, Tmat, bias_row)

    out = out.reshape(N, H, W, C_out)
    return jnp.transpose(out, (0, 3, 1, 2))   # back to NCHW


def mixed_op_reference(x_nchw, weights, wconv_hwio, cbs, cbb, proj_w, ps, pb):
    """Pure-JAX reference (lax conv / reduce_window) for correctness checking."""
    alphas = weights.reshape(-1).astype(jnp.float32)
    x = jnp.transpose(x_nchw, (0, 2, 3, 1)).astype(jnp.float32)
    N, H, W, C = x.shape
    Cout = proj_w.shape[1]
    pad = ((0, 0), (1, 1), (1, 1), (0, 0))

    skip = x
    avg = lax.reduce_window(x, 0.0, lax.add, (1, 3, 3, 1), (1, 1, 1, 1), pad) / 9.0
    mx = lax.reduce_window(x, -jnp.inf, lax.max, (1, 3, 3, 1), (1, 1, 1, 1), pad)
    conv = lax.conv_general_dilated(
        jnp.maximum(x, 0.0), wconv_hwio, (1, 1), ((1, 1), (1, 1)),
        dimension_numbers=('NHWC', 'HWIO', 'NHWC'))
    conv = conv * cbs.reshape(1, 1, 1, C) + cbb.reshape(1, 1, 1, C)

    def g(i):
        a = alphas[i]
        return jnp.where(a > 0.001, a, 0.0)

    mix = g(1) * skip + g(2) * avg + g(3) * mx + g(4) * conv
    y = jnp.einsum('nhwc,co->nhwo', mix, proj_w)
    y = y * ps.reshape(1, 1, 1, Cout) + pb.reshape(1, 1, 1, Cout)
    return jnp.transpose(y, (0, 3, 1, 2))


if __name__ == "__main__":
    key = jax.random.PRNGKey(0)
    k1, k2, k3 = jax.random.split(key, 3)

    N, C_in, C_out, H, W = 2, 4, 8, 16, 16
    eps = 1e-5

    x = jax.random.normal(k1, (N, C_in, H, W), jnp.float32)
    # architecture weights (shape (1, N_OPS), flattened like weights.view(-1));
    # op 0 ('none') is below the 0.001 gate.
    weights = jnp.array([[0.0004, 0.35, 0.25, 0.2, 0.1996]], jnp.float32)

    # conv3x3 weight in HWIO layout (== torch OIHW weight transposed to (kh,kw,ci,co))
    wconv = 0.1 * jax.random.normal(k2, (3, 3, C_in, C_in), jnp.float32)
    g1 = jnp.linspace(0.9, 1.1, C_in, dtype=jnp.float32)
    b1 = jnp.linspace(-0.1, 0.1, C_in, dtype=jnp.float32)
    conv_bn_scale = g1 / jnp.sqrt(1.0 + eps)          # running_mean=0, running_var=1
    conv_bn_bias = b1

    # proj 1x1 conv weight (ci, co)  (== torch (co, ci, 1, 1) transposed)
    proj_w = 0.1 * jax.random.normal(k3, (C_in, C_out), jnp.float32)
    g2 = jnp.linspace(0.95, 1.05, C_out, dtype=jnp.float32)
    b2 = jnp.linspace(-0.05, 0.05, C_out, dtype=jnp.float32)
    proj_scale = g2 / jnp.sqrt(1.0 + eps)
    proj_bias = b2

    # tolerance accounts for bf16-stored folded weights / the TPU default
    # (bf16-pass) matmul precision and the re-associated folded weights
    # vs. the unfolded f32 reference.
    def check(w):
        out = mixed_op_pallas(x, w, wconv, conv_bn_scale, conv_bn_bias,
                              proj_w, proj_scale, proj_bias)
        out = jax.block_until_ready(out)
        ref = mixed_op_reference(x, w, wconv, conv_bn_scale, conv_bn_bias,
                                 proj_w, proj_scale, proj_bias)
        assert out.shape == (N, C_out, H, W), out.shape
        err = float(jnp.max(jnp.abs(out - ref)))
        assert jnp.allclose(out, ref, rtol=2e-3, atol=2e-3), err

    check(weights)
    # also exercise the pl.when path where the conv branch is gated off
    check(jnp.array([[0.0004, 0.4, 0.3, 0.3, 0.0005]], jnp.float32))
    print("KERNEL_OK")
</pallas_src>

<mosaic_0001>
module attributes {stable_mosaic.version = 11 : i64} {
  func.func @_mixed_op_kernel(%arg0: i32, %arg1: memref<4xf32, #tpu.memory_space<smem>>, %arg2: memref<2x18x72xf32, #tpu.memory_space<vmem>>, %arg3: memref<64x128xbf16, #tpu.memory_space<vmem>>, %arg4: memref<3x72x128xbf16, #tpu.memory_space<vmem>>, %arg5: memref<1x128xf32, #tpu.memory_space<vmem>>, %arg6: memref<2x16x128xf32, #tpu.memory_space<vmem>>) attributes {dimension_semantics = [#tpu.dimension_semantics<parallel>], iteration_bounds = array<i64: 1>, scalar_prefetch = 0 : i64, scratch_operands = 0 : i64, tpu.core_type = #tpu.core_type<tc>, window_params = [{transform_indices = @transform_0, window_bounds = array<i64: 4>}, {transform_indices = @transform_1, window_bounds = array<i64: 2, 18, 72>}, {pipeline_mode = #tpu.pipeline_mode<synchronous>, transform_indices = @transform_2, window_bounds = array<i64: 64, 128>}, {pipeline_mode = #tpu.pipeline_mode<synchronous>, transform_indices = @transform_3, window_bounds = array<i64: 3, 72, 128>}, {pipeline_mode = #tpu.pipeline_mode<synchronous>, transform_indices = @transform_4, window_bounds = array<i64: 1, 128>}, {transform_indices = @transform_5, window_bounds = array<i64: 2, 16, 128>}]} {
    %c0 = arith.constant 0 : index
    %c0_0 = arith.constant 0 : index
    %c0_1 = arith.constant 0 : index
    %0 = vector.load %arg2[%c0, %c0_0, %c0_1] : memref<2x18x72xf32, #tpu.memory_space<vmem>>, vector<2x18x72xf32>
    %1 = tpu.iota {dimensions = array<i32: 0>} : vector<18x72xi32>
    %2 = tpu.iota {dimensions = array<i32: 1>} : vector<18x72xi32>
    %c0_i32 = arith.constant 0 : i32
    %3 = vector.broadcast %c0_i32 : i32 to vector<18x72xi32>
    %4 = arith.cmpi eq, %1, %3 : vector<18x72xi32>
    %c17_i32 = arith.constant 17 : i32
    %5 = vector.broadcast %c17_i32 : i32 to vector<18x72xi32>
    %6 = arith.cmpi eq, %1, %5 : vector<18x72xi32>
    %7 = arith.ori %4, %6 : vector<18x72xi1>
    %c4_i32 = arith.constant 4 : i32
    %8 = vector.broadcast %c4_i32 : i32 to vector<18x72xi32>
    %9 = arith.cmpi slt, %2, %8 : vector<18x72xi32>
    %10 = arith.ori %7, %9 : vector<18x72xi1>
    %c68_i32 = arith.constant 68 : i32
    %11 = vector.broadcast %c68_i32 : i32 to vector<18x72xi32>
    %12 = arith.cmpi sge, %2, %11 : vector<18x72xi32>
    %13 = arith.ori %10, %12 : vector<18x72xi1>
    %14 = vector.shape_cast %13 : vector<18x72xi1> to vector<1x18x72xi1>
    %cst = arith.constant -1.000000e+30 : f32
    %15 = vector.shape_cast %14 : vector<1x18x72xi1> to vector<1x18x72xi1>
    %16 = vector.broadcast %15 : vector<1x18x72xi1> to vector<2x18x72xi1>
    %17 = vector.broadcast %cst : f32 to vector<2x18x72xf32>
    %18 = arith.select %16, %17, %0 : vector<2x18x72xi1>, vector<2x18x72xf32>
    %c0_2 = arith.constant 0 : index
    %19 = memref.load %arg1[%c0_2] : memref<4xf32, #tpu.memory_space<smem>>
    %c1 = arith.constant 1 : index
    %20 = memref.load %arg1[%c1] : memref<4xf32, #tpu.memory_space<smem>>
    %c2 = arith.constant 2 : index
    %21 = memref.load %arg1[%c2] : memref<4xf32, #tpu.memory_space<smem>>
    %c3 = arith.constant 3 : index
    %22 = memref.load %arg1[%c3] : memref<4xf32, #tpu.memory_space<smem>>
    %cst_3 = arith.constant 0.000000e+00 : f32
    %23 = arith.cmpf ogt, %22, %cst_3 : f32
    %24 = vector.extract_strided_slice %0 {offsets = [0, 0, 0], sizes = [2, 16, 72], strides = [1, 1, 1]} : vector<2x18x72xf32> to vector<2x16x72xf32>
    %25 = vector.extract_strided_slice %18 {offsets = [0, 0, 0], sizes = [2, 16, 72], strides = [1, 1, 1]} : vector<2x18x72xf32> to vector<2x16x72xf32>
    %26 = vector.extract_strided_slice %24 {offsets = [0, 0, 0], sizes = [2, 16, 64], strides = [1, 1, 1]} : vector<2x16x72xf32> to vector<2x16x64xf32>
    %27 = vector.extract_strided_slice %25 {offsets = [0, 0, 0], sizes = [2, 16, 64], strides = [1, 1, 1]} : vector<2x16x72xf32> to vector<2x16x64xf32>
    %28 = vector.extract_strided_slice %24 {offsets = [0, 0, 4], sizes = [2, 16, 64], strides = [1, 1, 1]} : vector<2x16x72xf32> to vector<2x16x64xf32>
    %29 = arith.addf %26, %28 : vector<2x16x64xf32>
    %30 = vector.extract_strided_slice %25 {offsets = [0, 0, 4], sizes = [2, 16, 64], strides = [1, 1, 1]} : vector<2x16x72xf32> to vector<2x16x64xf32>
    %31 = arith.maximumf %27, %30 : vector<2x16x64xf32>
    %32 = vector.extract_strided_slice %24 {offsets = [0, 0, 8], sizes = [2, 16, 64], strides = [1, 1, 1]} : vector<2x16x72xf32> to vector<2x16x64xf32>
    %33 = arith.addf %29, %32 : vector<2x16x64xf32>
    %34 = vector.extract_strided_slice %25 {offsets = [0, 0, 8], sizes = [2, 16, 64], strides = [1, 1, 1]} : vector<2x16x72xf32> to vector<2x16x64xf32>
    %35 = arith.maximumf %31, %34 : vector<2x16x64xf32>
    %36 = vector.extract_strided_slice %0 {offsets = [0, 1, 0], sizes = [2, 16, 72], strides = [1, 1, 1]} : vector<2x18x72xf32> to vector<2x16x72xf32>
    %37 = vector.extract_strided_slice %18 {offsets = [0, 1, 0], sizes = [2, 16, 72], strides = [1, 1, 1]} : vector<2x18x72xf32> to vector<2x16x72xf32>
    %38 = vector.extract_strided_slice %36 {offsets = [0, 0, 0], sizes = [2, 16, 64], strides = [1, 1, 1]} : vector<2x16x72xf32> to vector<2x16x64xf32>
    %39 = arith.addf %33, %38 : vector<2x16x64xf32>
    %40 = vector.extract_strided_slice %37 {offsets = [0, 0, 0], sizes = [2, 16, 64], strides = [1, 1, 1]} : vector<2x16x72xf32> to vector<2x16x64xf32>
    %41 = arith.maximumf %35, %40 : vector<2x16x64xf32>
    %42 = vector.extract_strided_slice %36 {offsets = [0, 0, 4], sizes = [2, 16, 64], strides = [1, 1, 1]} : vector<2x16x72xf32> to vector<2x16x64xf32>
    %43 = arith.addf %39, %42 : vector<2x16x64xf32>
    %44 = vector.extract_strided_slice %37 {offsets = [0, 0, 4], sizes = [2, 16, 64], strides = [1, 1, 1]} : vector<2x16x72xf32> to vector<2x16x64xf32>
    %45 = arith.maximumf %41, %44 : vector<2x16x64xf32>
    %46 = vector.extract_strided_slice %36 {offsets = [0, 0, 8], sizes = [2, 16, 64], strides = [1, 1, 1]} : vector<2x16x72xf32> to vector<2x16x64xf32>
    %47 = arith.addf %43, %46 : vector<2x16x64xf32>
    %48 = vector.extract_strided_slice %37 {offsets = [0, 0, 8], sizes = [2, 16, 64], strides = [1, 1, 1]} : vector<2x16x72xf32> to vector<2x16x64xf32>
    %49 = arith.maximumf %45, %48 : vector<2x16x64xf32>
    %50 = vector.extract_strided_slice %0 {offsets = [0, 2, 0], sizes = [2, 16, 72], strides = [1, 1, 1]} : vector<2x18x72xf32> to vector<2x16x72xf32>
    %51 = vector.extract_strided_slice %18 {offsets = [0, 2, 0], sizes = [2, 16, 72], strides = [1, 1, 1]} : vector<2x18x72xf32> to vector<2x16x72xf32>
    %52 = vector.extract_strided_slice %50 {offsets = [0, 0, 0], sizes = [2, 16, 64], strides = [1, 1, 1]} : vector<2x16x72xf32> to vector<2x16x64xf32>
    %53 = arith.addf %47, %52 : vector<2x16x64xf32>
    %54 = vector.extract_strided_slice %51 {offsets = [0, 0, 0], sizes = [2, 16, 64], strides = [1, 1, 1]} : vector<2x16x72xf32> to vector<2x16x64xf32>
    %55 = arith.maximumf %49, %54 : vector<2x16x64xf32>
    %56 = vector.extract_strided_slice %50 {offsets = [0, 0, 4], sizes = [2, 16, 64], strides = [1, 1, 1]} : vector<2x16x72xf32> to vector<2x16x64xf32>
    %57 = arith.addf %53, %56 : vector<2x16x64xf32>
    %58 = vector.extract_strided_slice %51 {offsets = [0, 0, 4], sizes = [2, 16, 64], strides = [1, 1, 1]} : vector<2x16x72xf32> to vector<2x16x64xf32>
    %59 = arith.maximumf %55, %58 : vector<2x16x64xf32>
    %60 = vector.extract_strided_slice %50 {offsets = [0, 0, 8], sizes = [2, 16, 64], strides = [1, 1, 1]} : vector<2x16x72xf32> to vector<2x16x64xf32>
    %61 = arith.addf %57, %60 : vector<2x16x64xf32>
    %62 = vector.extract_strided_slice %51 {offsets = [0, 0, 8], sizes = [2, 16, 64], strides = [1, 1, 1]} : vector<2x16x72xf32> to vector<2x16x64xf32>
    %63 = arith.maximumf %59, %62 : vector<2x16x64xf32>
    %64 = vector.broadcast %19 : f32 to vector<2x16x64xf32>
    %65 = arith.mulf %64, %42 : vector<2x16x64xf32>
    %66 = vector.broadcast %20 : f32 to vector<2x16x64xf32>
    %67 = arith.mulf %66, %61 : vector<2x16x64xf32>
    %68 = arith.addf %65, %67 : vector<2x16x64xf32>
    %69 = vector.broadcast %21 : f32 to vector<2x16x64xf32>
    %70 = arith.mulf %69, %63 : vector<2x16x64xf32>
    %71 = arith.addf %68, %70 : vector<2x16x64xf32>
    %72 = vector.shape_cast %71 : vector<2x16x64xf32> to vector<32x64xf32>
    %73 = arith.truncf %72 : vector<32x64xf32> to vector<32x64xbf16>
    %c0_4 = arith.constant 0 : index
    %c0_5 = arith.constant 0 : index
    %74 = vector.load %arg3[%c0_4, %c0_5] : memref<64x128xbf16, #tpu.memory_space<vmem>>, vector<64x128xbf16>
    %cst_6 = arith.constant dense<0.000000e+00> : vector<32x128xf32>
    %75 = tpu.matmul %73, %74, %cst_6 {dimension_numbers = #tpu.dot_dimension_numbers<[1], [0], [0], [1], [0, 0, 1, 1], [], []>} : vector<32x64xbf16>, vector<64x128xbf16>, vector<32x128xf32> -> vector<32x128xf32>
    %c0_7 = arith.constant 0 : index
    %c0_8 = arith.constant 0 : index
    %76 = vector.load %arg5[%c0_7, %c0_8] : memref<1x128xf32, #tpu.memory_space<vmem>>, vector<1x128xf32>
    %77 = vector.broadcast %76 : vector<1x128xf32> to vector<32x128xf32>
    %78 = arith.addf %75, %77 : vector<32x128xf32>
    %79 = vector.shape_cast %78 : vector<32x128xf32> to vector<2x16x128xf32>
    %c0_9 = arith.constant 0 : index
    %c0_10 = arith.constant 0 : index
    %c0_11 = arith.constant 0 : index
    %80 = vector.load %arg6[%c0_9, %c0_10, %c0_11] : memref<2x16x128xf32, #tpu.memory_space<vmem>>, vector<2x16x128xf32>
    tpu.vector_store %arg6[%c0_9, %c0_10, %c0_11], %79 {strides = array<i32>} : memref<2x16x128xf32, #tpu.memory_space<vmem>>, vector<2x16x128xf32>,
    %81 = arith.extui %23 : i1 to i32
    %c0_i32_12 = arith.constant 0 : i32
    %82 = arith.cmpi ne, %81, %c0_i32_12 : i32
    scf.if %82 {
      %83 = vector.extract_strided_slice %0 {offsets = [0, 0, 0], sizes = [2, 16, 72], strides = [1, 1, 1]} : vector<2x18x72xf32> to vector<2x16x72xf32>
      %cst_13 = arith.constant 0.000000e+00 : f32
      %84 = vector.broadcast %cst_13 : f32 to vector<2x16x72xf32>
      %85 = arith.maximumf %83, %84 : vector<2x16x72xf32>
      %86 = vector.shape_cast %85 : vector<2x16x72xf32> to vector<32x72xf32>
      %87 = arith.truncf %86 : vector<32x72xf32> to vector<32x72xbf16>
      %c0_14 = arith.constant 0 : index
      %c0_15 = arith.constant 0 : index
      %c0_16 = arith.constant 0 : index
      %88 = vector.load %arg4[%c0_14, %c0_15, %c0_16] : memref<3x72x128xbf16, #tpu.memory_space<vmem>>, vector<1x72x128xbf16>
      %89 = vector.shape_cast %88 : vector<1x72x128xbf16> to vector<72x128xbf16>
      %cst_17 = arith.constant dense<0.000000e+00> : vector<32x128xf32>
      %90 = tpu.matmul %87, %89, %cst_17 {dimension_numbers = #tpu.dot_dimension_numbers<[1], [0], [0], [1], [0, 0, 1, 1], [], []>} : vector<32x72xbf16>, vector<72x128xbf16>, vector<32x128xf32> -> vector<32x128xf32>
      %91 = vector.extract_strided_slice %0 {offsets = [0, 1, 0], sizes = [2, 16, 72], strides = [1, 1, 1]} : vector<2x18x72xf32> to vector<2x16x72xf32>
      %cst_18 = arith.constant 0.000000e+00 : f32
      %92 = vector.broadcast %cst_18 : f32 to vector<2x16x72xf32>
      %93 = arith.maximumf %91, %92 : vector<2x16x72xf32>
      %94 = vector.shape_cast %93 : vector<2x16x72xf32> to vector<32x72xf32>
      %95 = arith.truncf %94 : vector<32x72xf32> to vector<32x72xbf16>
      %c1_19 = arith.constant 1 : index
      %c0_20 = arith.constant 0 : index
      %c0_21 = arith.constant 0 : index
      %96 = vector.load %arg4[%c1_19, %c0_20, %c0_21] : memref<3x72x128xbf16, #tpu.memory_space<vmem>>, vector<1x72x128xbf16>
      %97 = vector.shape_cast %96 : vector<1x72x128xbf16> to vector<72x128xbf16>
      %cst_22 = arith.constant dense<0.000000e+00> : vector<32x128xf32>
      %98 = tpu.matmul %95, %97, %cst_22 {dimension_numbers = #tpu.dot_dimension_numbers<[1], [0], [0], [1], [0, 0, 1, 1], [], []>} : vector<32x72xbf16>, vector<72x128xbf16>, vector<32x128xf32> -> vector<32x128xf32>
      %99 = arith.addf %90, %98 : vector<32x128xf32>
      %100 = vector.extract_strided_slice %0 {offsets = [0, 2, 0], sizes = [2, 16, 72], strides = [1, 1, 1]} : vector<2x18x72xf32> to vector<2x16x72xf32>
      %cst_23 = arith.constant 0.000000e+00 : f32
      %101 = vector.broadcast %cst_23 : f32 to vector<2x16x72xf32>
      %102 = arith.maximumf %100, %101 : vector<2x16x72xf32>
      %103 = vector.shape_cast %102 : vector<2x16x72xf32> to vector<32x72xf32>
      %104 = arith.truncf %103 : vector<32x72xf32> to vector<32x72xbf16>
      %c2_24 = arith.constant 2 : index
      %c0_25 = arith.constant 0 : index
      %c0_26 = arith.constant 0 : index
      %105 = vector.load %arg4[%c2_24, %c0_25, %c0_26] : memref<3x72x128xbf16, #tpu.memory_space<vmem>>, vector<1x72x128xbf16>
      %106 = vector.shape_cast %105 : vector<1x72x128xbf16> to vector<72x128xbf16>
      %cst_27 = arith.constant dense<0.000000e+00> : vector<32x128xf32>
      %107 = tpu.matmul %104, %106, %cst_27 {dimension_numbers = #tpu.dot_dimension_numbers<[1], [0], [0], [1], [0, 0, 1, 1], [], []>} : vector<32x72xbf16>, vector<72x128xbf16>, vector<32x128xf32> -> vector<32x128xf32>
      %108 = arith.addf %99, %107 : vector<32x128xf32>
      %c0_28 = arith.constant 0 : index
      %c0_29 = arith.constant 0 : index
      %c0_30 = arith.constant 0 : index
      %109 = vector.load %arg6[%c0_28, %c0_29, %c0_30] : memref<2x16x128xf32, #tpu.memory_space<vmem>>, vector<2x16x128xf32>
      %110 = vector.shape_cast %108 : vector<32x128xf32> to vector<2x16x128xf32>
      %111 = arith.addf %109, %110 : vector<2x16x128xf32>
      %c0_31 = arith.constant 0 : index
      %c0_32 = arith.constant 0 : index
      %c0_33 = arith.constant 0 : index
      %112 = vector.load %arg6[%c0_31, %c0_32, %c0_33] : memref<2x16x128xf32, #tpu.memory_space<vmem>>, vector<2x16x128xf32>
      tpu.vector_store %arg6[%c0_31, %c0_32, %c0_33], %111 {strides = array<i32>} : memref<2x16x128xf32, #tpu.memory_space<vmem>>, vector<2x16x128xf32>,
    } else {
    }
    return
  }
  func.func @transform_0(%arg0: i32) -> i32 {
    %c0_i32 = arith.constant 0 : i32
    %c0_i32_0 = arith.constant 0 : i32
    return %c0_i32 : i32
  }
  func.func @transform_1(%arg0: i32) -> (i32, i32, i32) {
    %c0_i32 = arith.constant 0 : i32
    %c0_i32_0 = arith.constant 0 : i32
    %c0_i32_1 = arith.constant 0 : i32
    return %arg0, %c0_i32, %c0_i32_0 : i32, i32, i32
  }
  func.func @transform_2(%arg0: i32) -> (i32, i32) {
    %c0_i32 = arith.constant 0 : i32
    %c0_i32_0 = arith.constant 0 : i32
    %c0_i32_1 = arith.constant 0 : i32
    return %c0_i32, %c0_i32_0 : i32, i32
  }
  func.func @transform_3(%arg0: i32) -> (i32, i32, i32) {
    %c0_i32 = arith.constant 0 : i32
    %c0_i32_0 = arith.constant 0 : i32
    %c0_i32_1 = arith.constant 0 : i32
    %c0_i32_2 = arith.constant 0 : i32
    return %c0_i32, %c0_i32_0, %c0_i32_1 : i32, i32, i32
  }
  func.func @transform_4(%arg0: i32) -> (i32, i32) {
    %c0_i32 = arith.constant 0 : i32
    %c0_i32_0 = arith.constant 0 : i32
    %c0_i32_1 = arith.constant 0 : i32
    return %c0_i32, %c0_i32_0 : i32, i32
  }
  func.func @transform_5(%arg0: i32) -> (i32, i32, i32) {
    %c0_i32 = arith.constant 0 : i32
    %c0_i32_0 = arith.constant 0 : i32
    %c0_i32_1 = arith.constant 0 : i32
    return %arg0, %c0_i32, %c0_i32_0 : i32, i32, i32
  }
}

</mosaic_0001>

<bundles_post_ra>
// kernel: tile.8
= control target key start
LH: loop header
LB: loop body
LE: loop exit
PB: predicated region body
PF: predicated region fallthrough
CT: control target
= control target key end

     0   :  { %s28_s0 = inlined_call_operand.vmem [shape: f32[8], index: 0, kind: input, shape index: {}]   ;;  %s29_s1 = inlined_call_operand.vmem [shape: f32[16,8], index: 1, kind: output, shape index: {}]  }
   0x1   :  { %v4_v0 = vld [vmem:[%s28_s0] ss:$0 sm:$0xff] }
   0x2   :  { %5 = vst [vmem:[%s29_s1] sm:$0xff] %v4_v0  ;;  %8 = vst [vmem:[%s29_s1 + $0x8] sm:$0xff] %v4_v0 }

// kernel: tile.9
= control target key start
LH: loop header
LB: loop body
LE: loop exit
PB: predicated region body
PF: predicated region fallthrough
CT: control target
= control target key end

     0   :  { %s133_s10 = smov 120   ;;  %s134_s11 = smov 104   ;;  %vm3_vm0 = vcmask 64512   ;;  %vm9_vm1 = vcmask 1048512   ;;  %vm15_vm2 = vcmask 982912   ;;  %vm21_vm3 = vcmask 917312   ;;  %s209_s0 = inlined_call_operand.vmem [shape: f32[16,8], index: 0, kind: input, shape index: {}]   ;;  %s210_s1 = inlined_call_operand.vmem [shape: f32[1,128], index: 1, kind: output, shape index: {}]  }
   0x1   :  { %v103_v0 = vld [vmem:[%s209_s0 + $0xf] sm:$0x1]   ;;  %v105_v1 = vld [vmem:[%s209_s0 + $0xd] sm:$0x1]   ;;  %v104_v2 = vld [vmem:[%s209_s0 + $0xe] sm:$0x1]  }
   0x2   :  { %7 = vrot.lane.b32.xlu0 %v103_v0, %s133_s10  ;;  %19 = vrot.lane.b32.xlu1 %v105_v1, %s134_s11  ;;  %v106_v3 = vld [vmem:[%s209_s0 + $0xc] sm:$0x1]   ;;  %s135_s16 = smov 112   ;;  %s136_s17 = smov 96   ;;  %v107_v4 = vld [vmem:[%s209_s0 + $0xb] sm:$0x1]  }
   0x3   :  { %v108_v5 = vld [vmem:[%s209_s0 + $0xa] sm:$0x1]   ;;  %v2_v6 = vld [vmem:[%s209_s0] sm:$0x1]   ;;  %s137_s24 = smov 88   ;;  %s138_s25 = smov 80  }
   0x4   :  { %4 = vst.msk [vmem:[#allocation0] sm:$0x1] %vm3_vm0, %v2_v6   ;;  %v109_v7 = vld [vmem:[%s209_s0 + $0x9] sm:$0x1]   ;;  %v110_v8 = vld [vmem:[%s209_s0 + $0x8] sm:$0x1]  }
   0x5   :  { %s139_s30 = smov 72   ;;  %s140_s2 = smov 64   ;;  %v111_v9 = vld [vmem:[%s209_s0 + $0x7] sm:$0x1]   ;;  %v112_v10 = vld [vmem:[%s209_s0 + $0x6] sm:$0x1]  }
   0x6   :  { %13 = vrot.lane.b32.xlu0 %v104_v2, %s135_s16  ;;  %25 = vrot.lane.b32.xlu1 %v106_v3, %s136_s17  ;;  %s141_s7 = smov 56   ;;  %s142_s8 = smov 48   ;;  %v113_v11 = vld [vmem:[%s209_s0 + $0x5] sm:$0x1]   ;;  %v114_v12 = vld [vmem:[%s209_s0 + $0x4] sm:$0x1]  }
   0x7   :  { %s143_s13 = smov 40   ;;  %s144_s14 = smov 32   ;;  %v115_v13 = vld [vmem:[%s209_s0 + $0x3] sm:$0x1]   ;;  %v116_v14 = vld [vmem:[%s209_s0 + $0x2] sm:$0x1]  }
   0x8   :  { %s145_s19 = smov 24   ;;  %s146_s20 = smov 16   ;;  %v117_v15 = vld [vmem:[%s209_s0 + $0x1] sm:$0x1]   ;;  %vm27_vm4 = vcmask 851712   ;;  %vm33_vm5 = vcmask 786112  }
   0x9   :  { %s147_s0 = smov 8   ;;  %vm39_vm6 = vcmask 720512   ;;  %vm45_vm7 = vcmask 654912   ;;  %vm51_vm8 = vcmask 589312   ;;  %vm57_vm9 = vcmask 523712  }
   0xa   :  { %31 = vrot.lane.b32.xlu0 %v107_v4, %s137_s24  ;;  %37 = vrot.lane.b32.xlu1 %v108_v5, %s138_s25  ;;  %vm63_vm10 = vcmask 458112   ;;  %vm69_vm11 = vcmask 392512   ;;  %vm75_vm12 = vcmask 326912   ;;  %vm81_vm13 = vcmask 261312  }
   0xb   :  { %vm87_vm14 = vcmask 195712   ;;  %vm93_vm15 = vcmask 130112  }
   0xe   :  { %43 = vrot.lane.b32.xlu0 %v109_v7, %s139_s30  ;;  %49 = vrot.lane.b32.xlu1 %v110_v8, %s140_s2 }
  0x12   :  { %55 = vrot.lane.b32.xlu0 %v111_v9, %s141_s7  ;;  %61 = vrot.lane.b32.xlu1 %v112_v10, %s142_s8 }
  0x16   :  { %67 = vrot.lane.b32.xlu0 %v113_v11, %s143_s13  ;;  %73 = vrot.lane.b32.xlu1 %v114_v12, %s144_s14 }
  0x1a   :  { %79 = vrot.lane.b32.xlu0 %v115_v13, %s145_s19  ;;  %85 = vrot.lane.b32.xlu1 %v116_v14, %s146_s20 }
  0x1e   :  { %91 = vrot.lane.b32.xlu0 %v117_v15, %s147_s0 }
  0x74   :  { %v8_v16 = vpop.permute.xlu0 %7   ;;  %v20_v17 = vpop.permute.xlu1 %19  }
  0x75   :  { %10 = vst.msk [vmem:[#allocation0] sm:$0x1] %vm9_vm1, %v8_v16  }
  0x78   :  { %v14_v18 = vpop.permute.xlu0 %13   ;;  %v26_v19 = vpop.permute.xlu1 %25  }
  0x79   :  { %16 = vst.msk [vmem:[#allocation0] sm:$0x1] %vm15_vm2, %v14_v18  }
  0x7a   :  { %22 = vst.msk [vmem:[#allocation0] sm:$0x1] %vm21_vm3, %v20_v17  }
  0x7b   :  { %28 = vst.msk [vmem:[#allocation0] sm:$0x1] %vm27_vm4, %v26_v19  }
  0x7c   :  { %v32_v20 = vpop.permute.xlu0 %31   ;;  %v38_v21 = vpop.permute.xlu1 %37  }
  0x7d   :  { %34 = vst.msk [vmem:[#allocation0] sm:$0x1] %vm33_vm5, %v32_v20  }
  0x7e   :  { %40 = vst.msk [vmem:[#allocation0] sm:$0x1] %vm39_vm6, %v38_v21  }
  0x80   :  { %v44_v22 = vpop.permute.xlu0 %43   ;;  %v50_v23 = vpop.permute.xlu1 %49  }
  0x81   :  { %46 = vst.msk [vmem:[#allocation0] sm:$0x1] %vm45_vm7, %v44_v22  }
  0x82   :  { %52 = vst.msk [vmem:[#allocation0] sm:$0x1] %vm51_vm8, %v50_v23  }
  0x84   :  { %v56_v24 = vpop.permute.xlu0 %55   ;;  %v62_v25 = vpop.permute.xlu1 %61  }
  0x85   :  { %58 = vst.msk [vmem:[#allocation0] sm:$0x1] %vm57_vm9, %v56_v24  }
  0x86   :  { %64 = vst.msk [vmem:[#allocation0] sm:$0x1] %vm63_vm10, %v62_v25  }
  0x88   :  { %v68_v26 = vpop.permute.xlu0 %67   ;;  %v74_v27 = vpop.permute.xlu1 %73  }
  0x89   :  { %70 = vst.msk [vmem:[#allocation0] sm:$0x1] %vm69_vm11, %v68_v26  }
  0x8a   :  { %76 = vst.msk [vmem:[#allocation0] sm:$0x1] %vm75_vm12, %v74_v27  }
  0x8c   :  { %v80_v28 = vpop.permute.xlu0 %79   ;;  %v86_v29 = vpop.permute.xlu1 %85  }
  0x8d   :  { %82 = vst.msk [vmem:[#allocation0] sm:$0x1] %vm81_vm13, %v80_v28  }
  0x8e   :  { %88 = vst.msk [vmem:[#allocation0] sm:$0x1] %vm87_vm14, %v86_v29  }
  0x90   :  { %v92_v30 = vpop.permute.xlu0 %91  }
  0x91   :  { %94 = vst.msk [vmem:[#allocation0] sm:$0x1] %vm93_vm15, %v92_v30  }
  0x98   :  { %v99_v31 = vld [vmem:[#allocation0] sm:$0x1] }
  0x99   :  { %102 = vst [vmem:[%s210_s1] sm:$0x1] %v99_v31 }

// kernel: mixed_op_pallas.1
= control target key start
LH: loop header
LB: loop body
LE: loop exit
PB: predicated region body
PF: predicated region fallthrough
CT: control target
= control target key end

     0   :  { %10 = vsyncpa [#allocation3], 0  ;;  %s1562_s0 = inlined_call_operand.vmem [shape: f32[4], index: 0, kind: input, shape index: {}]   ;;  %s1563_s1 = inlined_call_operand.vmem [shape: f32[2,18,72], index: 1, kind: input, shape index: {}]   ;;  %s1564_s2 = inlined_call_operand.vmem [shape: bf16[64,128], index: 2, kind: input, shape index: {}]   ;;  %s1565_s3 = inlined_call_operand.vmem [shape: bf16[3,72,128], index: 3, kind: input, shape index: {}]   ;;  %s1566_s4 = inlined_call_operand.vmem [shape: f32[1,128], index: 4, kind: input, shape index: {}]   ;;  %s1567_s5 = inlined_call_operand.vmem [shape: f32[2,16,128], index: 5, kind: output, shape index: {}]  }
   0x1   :  { %s17_s20 = sshll.u32 %s1562_s0, 4  ;;  %s18_s20 = int_to_ptr.vmem [resolvable:$true] %s17_s20 }
   0x2   :  { %s1083_s21 = scalar_lea.vmem %s18_s20, 16  ;;  %p1088_p1 = scmp.lt.s32.totalorder %s18_s20, %s18_s20 }
   0x3   :  { %p1084_p0 = scmp.ne.s32.totalorder %s18_s20, %s1083_s21  ;;  %p1089_p2 = scmp.lt.s32.totalorder %s1083_s21, %s1083_s21 }
   0x5   :  { %p1090_p3 = por %p1089_p2, %p1088_p1 }
   0x7   :  { %p1091_p4 = pnand %p1090_p3, %p1084_p0 }
   0x9   :  { %1094 = shalt.err (!%p1091_p4)
}
   0xa   :  { %s1097_s22 = smov [#allocation2]  }
   0xb   :  { %20 = dma.vmem_to_smem %s18_s20, 16, %s1097_s22, [#allocation3]  }
   0xc   :  { %1095 = dma.done.wait [#allocation3], 16  }
   0xd   :  { %1096 = vsyncadd [#allocation3], 4294967280 }
   0xe   :  { %32 = sfence }
   0xf   :  { %v1137_v0 = vld [vmem:[%s1563_s1 + $0x18] sm:$0xff]  ;;  %v1142_v1 = vld [vmem:[%s1563_s1] sm:$0xff]  ;;  %v40_v2 = vlaneseq  ;;  %s1098_s26 = smov 124   ;;  %v1156_v4 = vld [vmem:[%s1563_s1 + $0x8] sm:$0xff]  ;;  %s1099_s6 = smov 120   ;;  %vm154_vm8 = vcmask 1046528  }
  0x10   :  { %1576 = vst [vmem:[#allocation5_spill] sm:$0xff] %v1142_v1  ;;  %88 = vrot.lane.b32.xlu1 %v1137_v0, %s1098_s26  ;;  %84 = vrot.lane.b32.xlu0 %v1142_v1, %s1098_s26  ;;  %v1151_v3 = vld [vmem:[%s1563_s1 + $0x20] sm:$0xff]  ;;  %1577 = vst [vmem:[#allocation6_spill] sm:$0xff] %v1156_v4  ;;  %v1197_v12 = vld [vmem:[%s1563_s1 + $0x10] sm:$0x3]  ;;  %v156_v13 = vrot.slane %v1156_v4, 1 }
  0x11   :  { %v45_v5 = vand.u32 127, %v40_v2  ;;  %v41_v6 = vshrl.u32 %v40_v2, 7  ;;  %1578 = vst [vmem:[#allocation7_spill] sm:$0xff] %v1197_v12  ;;  %v158_v14 = vrot.slane %v1197_v12, 1  ;;  %v155_v15 = vrot.slane %v1142_v1, 1  ;;  %s928_s11 = sld [smem:[#allocation2 + $0x2]] }
  0x12   :  { %v1210_v16 = vld [vmem:[%s1563_s1 + $0x28] sm:$0x3]  ;;  %v161_v18 = vrot.slane %v1151_v3, 1  ;;  %v160_v19 = vrot.slane %v1137_v0, 1  ;;  %v259_v37 = vrot.slane %v1156_v4, 2  ;;  %v261_v38 = vrot.slane %v1197_v12, 2 }
  0x13   :  { %vm55_vm0 = vcmp.lt.s32.totalorder %v45_v5, 4  ;;  %vm59_vm1 = vcmp.ge.s32.totalorder %v45_v5, 68  ;;  %vm46_vm2 = vcmp.eq.s32.totalorder %v41_v6, 0  ;;  %v43_v11 = vadd.s32 16, %v41_v6  ;;  %1579 = vst [vmem:[#allocation8_spill] sm:$0xff] %v1210_v16  ;;  %s927_s1 = sld [smem:[#allocation2 + $0x1]] }
  0x14   :  { %90 = vrot.lane.b32.xlu1 %v1151_v3, %s1098_s26  ;;  %86 = vrot.lane.b32.xlu0 %v1156_v4, %s1098_s26  ;;  %vm61_vm3 = vmor %vm55_vm0, %vm59_vm1  ;;  %v1224_v20 = vsel %vm154_vm8, %v156_v13, %v158_v14  ;;  %v1227_v21 = vsel %vm154_vm8, %v155_v15, %v156_v13  ;;  %v163_v22 = vrot.slane %v1210_v16, 1  ;;  %v1238_v24 = vsel %vm154_vm8, %v160_v19, %v161_v18  ;;  %s1100_s12 = smov 4   ;;  %s1421_s13 = sld [smem:[#allocation2 + $0x3]] }
  0x15   :  { %v1165_v7 = vsel %vm61_vm3, -1e+30, %v1156_v4  ;;  %vm56_vm4 = vmor %vm46_vm2, %vm55_vm0  ;;  %v1181_v9 = vsel %vm61_vm3, -1e+30, %v1151_v3  ;;  %vm51_vm6 = vcmp.eq.s32.totalorder %v43_v11, 17  ;;  %v258_v39 = vrot.slane %v1142_v1, 2 }
  0x16   :  { %vm60_vm5 = vmor %vm56_vm4, %vm59_vm1  ;;  %v1241_v25 = vsel %vm154_vm8, %v161_v18, %v163_v22  ;;  %v176_v26 = vrot.slane %v1165_v7, 1  ;;  %v181_v32 = vrot.slane %v1181_v9, 1  ;;  %vm257_vm10 = vcmask 1045504   ;;  %s75_s20 = sld [smem:[#allocation2]] }
  0x17   :  { %v1170_v8 = vsel %vm60_vm5, -1e+30, %v1142_v1  ;;  %v1184_v10 = vsel %vm60_vm5, -1e+30, %v1137_v0  ;;  %vm58_vm7 = vmor %vm51_vm6, %vm55_vm0  ;;  %v264_v40 = vrot.slane %v1151_v3, 2  ;;  %v1295_v41 = vsel %vm257_vm10, %v259_v37, %v261_v38 }
  0x18   :  { %106 = vrot.lane.b32.xlu1 %v1165_v7, %s1098_s26  ;;  %104 = vrot.lane.b32.xlu0 %v1170_v8, %s1098_s26  ;;  %vm1213_vm9 = vmor %vm58_vm7, %vm59_vm1  ;;  %v175_v28 = vrot.slane %v1170_v8, 1  ;;  %v180_v34 = vrot.slane %v1184_v10, 1  ;;  %v1298_v42 = vsel %vm257_vm10, %v258_v39, %v259_v37  ;;  %v266_v43 = vrot.slane %v1210_v16, 2 }
  0x19   :  { %v71_v23 = vsel %vm1213_vm9, -1e+30, %v1197_v12  ;;  %v74_v31 = vsel %vm1213_vm9, -1e+30, %v1210_v16  ;;  %v263_v44 = vrot.slane %v1137_v0, 2  ;;  %v277_v45 = vrot.slane %v1165_v7, 2 }
  0x1a   :  { %v178_v27 = vrot.slane %v71_v23, 1  ;;  %v1253_v30 = vsel %vm154_vm8, %v175_v28, %v176_v26  ;;  %v183_v33 = vrot.slane %v74_v31, 1  ;;  %v1272_v36 = vsel %vm154_vm8, %v180_v34, %v181_v32  ;;  %p79_p5 = scmp.gt.f32.partialorder %s1421_s13, 0.0 }
  0x1b   :  { %v1308_v46 = vsel %vm257_vm10, %v264_v40, %v266_v43  ;;  %v1311_v47 = vsel %vm257_vm10, %v263_v44, %v264_v40  ;;  %v279_v48 = vrot.slane %v71_v23, 2  ;;  %v276_v49 = vrot.slane %v1170_v8, 2 }
  0x1c   :  { %122 = vrot.lane.b32.xlu1 %v1156_v4, %s1099_s6  ;;  %120 = vrot.lane.b32.xlu0 %v1142_v1, %s1099_s6  ;;  %v1250_v29 = vsel %vm154_vm8, %v176_v26, %v178_v27  ;;  %v1269_v35 = vsel %vm154_vm8, %v181_v32, %v183_v33  ;;  %v282_v52 = vrot.slane %v1181_v9, 2  ;;  %v284_v53 = vrot.slane %v74_v31, 2 }
  0x1d   :  { %v1319_v50 = vsel %vm257_vm10, %v277_v45, %v279_v48  ;;  %v1322_v51 = vsel %vm257_vm10, %v276_v49, %v277_v45  ;;  %v281_v54 = vrot.slane %v1184_v10, 2  ;;  %vm374_vm11 = vcmask 1040384  }
  0x1e   :  { %1582 = vst [vmem:[#allocation9_spill] sm:$0xff] %v1319_v50  ;;  %1583 = vst [vmem:[#allocation10_spill] sm:$0xff] %v1322_v51  ;;  %v1335_v55 = vsel %vm257_vm10, %v282_v52, %v284_v53  ;;  %vm511_vm12 = vcmask 523264   ;;  %vm657_vm13 = vcmask (%p79_p5), 1043456   ;;  %vm650_vm14 = vcmask (%p79_p5), 588800  }
  0x1f   :  { %1584 = vst [vmem:[#allocation11_spill] sm:$0xff] %v1335_v55  ;;  %v1338_v56 = vsel %vm257_vm10, %v281_v54, %v282_v52 }
  0x20   :  { %110 = vrot.lane.b32.xlu1 %v1181_v9, %s1098_s26  ;;  %108 = vrot.lane.b32.xlu0 %v1184_v10, %s1098_s26  ;;  %1585 = vst [vmem:[#allocation12_spill] sm:$0xff] %v1338_v56 }
  0x24   :  { %126 = vrot.lane.b32.xlu1 %v1151_v3, %s1099_s6  ;;  %124 = vrot.lane.b32.xlu0 %v1137_v0, %s1099_s6 }
  0x28   :  { %138 = vrot.lane.b32.xlu1 %v1165_v7, %s1099_s6  ;;  %136 = vrot.lane.b32.xlu0 %v1170_v8, %s1099_s6 }
  0x2c   :  { %142 = vrot.lane.b32.xlu1 %v1181_v9, %s1099_s6  ;;  %140 = vrot.lane.b32.xlu0 %v1184_v10, %s1099_s6 }
  0x30   :  { %195 = vrot.lane.b32.xlu1 %v1224_v20, %s1098_s26  ;;  %193 = vrot.lane.b32.xlu0 %v1227_v21, %s1098_s26 }
  0x34   :  { %199 = vrot.lane.b32.xlu1 %v1241_v25, %s1098_s26  ;;  %197 = vrot.lane.b32.xlu0 %v1238_v24, %s1098_s26 }
  0x38   :  { %211 = vrot.lane.b32.xlu1 %v1250_v29, %s1098_s26  ;;  %209 = vrot.lane.b32.xlu0 %v1253_v30, %s1098_s26 }
  0x3c   :  { %227 = vrot.lane.b32.xlu1 %v1224_v20, %s1099_s6  ;;  %225 = vrot.lane.b32.xlu0 %v1227_v21, %s1099_s6 }
  0x40   :  { %215 = vrot.lane.b32.xlu1 %v1269_v35, %s1098_s26  ;;  %213 = vrot.lane.b32.xlu0 %v1272_v36, %s1098_s26 }
  0x44   :  { %231 = vrot.lane.b32.xlu1 %v1241_v25, %s1099_s6  ;;  %229 = vrot.lane.b32.xlu0 %v1238_v24, %s1099_s6 }
  0x48   :  { %243 = vrot.lane.b32.xlu1 %v1250_v29, %s1099_s6  ;;  %241 = vrot.lane.b32.xlu0 %v1253_v30, %s1099_s6 }
  0x4c   :  { %247 = vrot.lane.b32.xlu1 %v1269_v35, %s1099_s6  ;;  %245 = vrot.lane.b32.xlu0 %v1272_v36, %s1099_s6 }
  0x50   :  { %296 = vrot.lane.b32.xlu1 %v1295_v41, %s1098_s26  ;;  %294 = vrot.lane.b32.xlu0 %v1298_v42, %s1098_s26 }
  0x54   :  { %300 = vrot.lane.b32.xlu1 %v1308_v46, %s1098_s26  ;;  %298 = vrot.lane.b32.xlu0 %v1311_v47, %s1098_s26 }
  0x58   :  { %312 = vrot.lane.b32.xlu1 %v1319_v50, %s1098_s26  ;;  %310 = vrot.lane.b32.xlu0 %v1322_v51, %s1098_s26 }
  0x5c   :  { %328 = vrot.lane.b32.xlu1 %v1295_v41, %s1099_s6  ;;  %326 = vrot.lane.b32.xlu0 %v1298_v42, %s1099_s6 }
  0x60   :  { %316 = vrot.lane.b32.xlu1 %v1335_v55, %s1098_s26  ;;  %314 = vrot.lane.b32.xlu0 %v1338_v56, %s1098_s26 }
  0x64   :  { %332 = vrot.lane.b32.xlu1 %v1308_v46, %s1099_s6  ;;  %330 = vrot.lane.b32.xlu0 %v1311_v47, %s1099_s6 }
  0x68   :  { %344 = vrot.lane.b32.xlu1 %v1319_v50, %s1099_s6  ;;  %342 = vrot.lane.b32.xlu0 %v1322_v51, %s1099_s6 }
  0x6c   :  { %348 = vrot.lane.b32.xlu1 %v1335_v55, %s1099_s6  ;;  %346 = vrot.lane.b32.xlu0 %v1338_v56, %s1099_s6 }
  0x82   :  { %v89_v57 = vpop.permute.xlu1 %88  ;;  %v85_v58 = vpop.permute.xlu0 %84 }
  0x83   :  { %v96_v43 = vadd.f32 %v85_v58, %v1142_v1  ;;  %v98_v55 = vadd.f32 %v89_v57, %v1137_v0 }
  0x86   :  { %v91_v59 = vpop.permute.xlu1 %90  ;;  %v87_v60 = vpop.permute.xlu0 %86 }
  0x87   :  { %v97_v44 = vadd.f32 %v87_v60, %v1156_v4  ;;  %v99_v56 = vadd.f32 %v91_v59, %v1151_v3 }
  0x8a   :  { %v107_v61 = vpop.permute.xlu1 %106  ;;  %v105_v62 = vpop.permute.xlu0 %104 }
  0x8e   :  { %v123_v63 = vpop.permute.xlu1 %122  ;;  %v121_v2 = vpop.permute.xlu0 %120 }
  0x8f   :  { %v133_v49 = vadd.f32 %v123_v63, %v97_v44  ;;  %v132_v52 = vadd.f32 %v121_v2, %v96_v43  ;;  %v117_v2 = vmax.f32 %v1165_v7, %v107_v61  ;;  %v116_v43 = vmax.f32 %v1170_v8, %v105_v62 }
  0x91   :  { %v170_v16 = vadd.f32 %v1224_v20, %v133_v49  ;;  %v169_v12 = vadd.f32 %v1227_v21, %v132_v52  ;;  %v1589_v52 = vld [vmem:[#allocation10_spill] sm:$0xff] }
  0x92   :  { %v111_v5 = vpop.permute.xlu1 %110  ;;  %v109_v6 = vpop.permute.xlu0 %108 }
  0x93   :  { %v118_v7 = vmax.f32 %v1184_v10, %v109_v6 }
  0x96   :  { %v127_v11 = vpop.permute.xlu1 %126  ;;  %v125_v13 = vpop.permute.xlu0 %124 }
  0x97   :  { %v135_v60 = vadd.f32 %v127_v11, %v99_v56  ;;  %v134_v50 = vadd.f32 %v125_v13, %v98_v55 }
  0x99   :  { %v172_v21 = vadd.f32 %v1241_v25, %v135_v60  ;;  %v365_v25 = vstv %s927_s1 }
  0x9a   :  { %v139_v14 = vpop.permute.xlu1 %138  ;;  %v137_v15 = vpop.permute.xlu0 %136 }
  0x9b   :  { %v149_v20 = vmax.f32 %v117_v2, %v139_v14  ;;  %v1591_v2 = vld [vmem:[#allocation12_spill] sm:$0xff] }
  0x9d   :  { %v190_v14 = vmax.f32 %v149_v20, %v1250_v29  ;;  %v405_v20 = vstv %s928_s11 }
  0x9e   :  { %v143_v17 = vpop.permute.xlu1 %142  ;;  %v141_v18 = vpop.permute.xlu0 %140 }
  0x9f   :  { %v150_v13 = vmax.f32 %v118_v7, %v141_v18 }
  0xa2   :  { %v196_v19 = vpop.permute.xlu1 %195  ;;  %v194_v22 = vpop.permute.xlu0 %193 }
  0xa3   :  { %v206_v51 = vadd.f32 %v196_v19, %v170_v16  ;;  %v205_v58 = vadd.f32 %v194_v22, %v169_v12  ;;  %v148_v16 = vmax.f32 %v116_v43, %v137_v15  ;;  %v171_v12 = vadd.f32 %v1238_v24, %v134_v50 }
  0xa6   :  { %v200_v23 = vpop.permute.xlu1 %199  ;;  %v198_v26 = vpop.permute.xlu0 %197 }
  0xa7   :  { %v208_v57 = vadd.f32 %v200_v23, %v172_v21  ;;  %v207_v8 = vadd.f32 %v198_v26, %v171_v12  ;;  %v191_v23 = vmax.f32 %v150_v13, %v1272_v36 }
  0xaa   :  { %v212_v27 = vpop.permute.xlu1 %211  ;;  %v210_v28 = vpop.permute.xlu0 %209 }
  0xae   :  { %v228_v31 = vpop.permute.xlu1 %227  ;;  %v226_v32 = vpop.permute.xlu0 %225 }
  0xaf   :  { %v237_v63 = vadd.f32 %v226_v32, %v205_v58 }
  0xb1   :  { %v272_v55 = vadd.f32 %v1298_v42, %v237_v63 }
  0xb2   :  { %v1356_v33 = vpop.permute.xlu1 %215  ;;  %v1358_v34 = vpop.permute.xlu0 %213 }
  0xb6   :  { %v232_v37 = vpop.permute.xlu1 %231  ;;  %v230_v38 = vpop.permute.xlu0 %229 }
  0xb7   :  { %v240_v15 = vadd.f32 %v232_v37, %v208_v57  ;;  %v239_v50 = vadd.f32 %v230_v38, %v207_v8 }
  0xb9   :  { %v275_v29 = vadd.f32 %v1308_v46, %v240_v15 }
  0xba   :  { %v1360_v39 = vpop.permute.xlu1 %243  ;;  %v1362_v40 = vpop.permute.xlu0 %241 }
  0xbe   :  { %v1366_v45 = vpop.permute.xlu1 %247  ;;  %v1368_v48 = vpop.permute.xlu0 %245 }
  0xbf   :  { %1586 = vst [vmem:[#allocation13_spill] sm:$0xff] %v1368_v48  ;;  %v238_v48 = vadd.f32 %v228_v31, %v206_v51  ;;  %v119_v51 = vmax.f32 %v1181_v9, %v111_v5  ;;  %v222_v9 = vmax.f32 %v190_v14, %v212_v27  ;;  %v274_v31 = vadd.f32 %v1311_v47, %v239_v50 }
  0xc1   :  { %v273_v56 = vadd.f32 %v1295_v41, %v238_v48  ;;  %v151_v11 = vmax.f32 %v119_v51, %v143_v17  ;;  %v189_v41 = vmax.f32 %v148_v16, %v1253_v30  ;;  %v254_v17 = vmax.f32 %v222_v9, %v1360_v39  ;;  %v1588_v48 = vld [vmem:[#allocation9_spill] sm:$0xff]  ;;  %v1064_v9 = vld [vmem:[%s1564_s2 + $0x18] sm:$0xff]  }
  0xc2   :  { %v297_v53 = vpop.permute.xlu1 %296  ;;  %v295_v54 = vpop.permute.xlu0 %294  ;;  %1003 = vmatprep.subr.bf16.mxu0 %v1064_v9 }
  0xc3   :  { %v307_v61 = vadd.f32 %v297_v53, %v273_v56  ;;  %v306_v62 = vadd.f32 %v295_v54, %v272_v55  ;;  %v221_v5 = vmax.f32 %v189_v41, %v210_v28  ;;  %v192_v6 = vmax.f32 %v151_v11, %v1269_v35  ;;  %1004 = vmatpush3.bf16.msra.mxu0 %v1064_v9  ;;  %v1068_v9 = vld [vmem:[%s1565_s3 + $0x44] ss:$0 sps:$4 sm:$0xff] (%p79_p5)  }
  0xc4   :  { %v223_v35 = vmax.f32 %v191_v23, %v1358_v34 }
  0xc5   :  { %v253_v30 = vmax.f32 %v221_v5, %v1362_v40  ;;  %v224_v28 = vmax.f32 %v192_v6, %v1356_v33  ;;  %v291_v40 = vmax.f32 %v254_v17, %v1588_v48  ;;  %v1065_v5 = vld [vmem:[%s1564_s2 + $0x10] sm:$0xff]  }
  0xc6   :  { %v301_v4 = vpop.permute.xlu1 %300  ;;  %v299_v1 = vpop.permute.xlu0 %298  ;;  %v1587_v38 = vld [vmem:[#allocation13_spill] sm:$0xff]  ;;  %1005 = vmatprep.subr.bf16.mxu0 %v1065_v5 }
  0xc7   :  { %v309_v37 = vadd.f32 %v301_v4, %v275_v29  ;;  %v308_v36 = vadd.f32 %v299_v1, %v274_v31  ;;  %v256_v46 = vmax.f32 %v224_v28, %v1366_v45  ;;  %v255_v39 = vmax.f32 %v223_v35, %v1587_v38  ;;  %v1590_v45 = vld [vmem:[#allocation11_spill] sm:$0xff]  ;;  %1006 = vmatpush3.bf16.msra.mxu0 %v1065_v5  ;;  %v1070_v5 = vld [vmem:[%s1565_s3 + $0x3c] sm:$0xff] (%p79_p5)  }
  0xc8   :  { %v290_v53 = vmax.f32 %v253_v30, %v1589_v52  ;;  %v358_v30 = vstv %s75_s20  ;;  %v1593_v28 = vld [vmem:[#allocation7_spill] sm:$0xff] }
  0xc9   :  { %v293_v63 = vmax.f32 %v256_v46, %v1590_v45  ;;  %v292_v43 = vmax.f32 %v255_v39, %v1591_v2  ;;  %v361_v35 = vmul.f32 %v358_v30, %v1593_v28  ;;  %v362_v46 = vmul.f32 %v358_v30, %v1137_v0  ;;  %v1594_v39 = vld [vmem:[#allocation6_spill] sm:$0xff] }
  0xca   :  { %v1377_v44 = vpop.permute.xlu1 %312  ;;  %v1379_v59 = vpop.permute.xlu0 %310  ;;  %v363_v38 = vmul.f32 %v358_v30, %v1151_v3  ;;  %v360_v48 = vmul.f32 %v358_v30, %v1594_v39 }
  0xcb   :  { %v323_v34 = vmax.f32 %v291_v40, %v1377_v44  ;;  %v322_v1 = vmax.f32 %v290_v53, %v1379_v59  ;;  %v1595_v53 = vld [vmem:[#allocation8_spill] sm:$0xff] }
  0xce   :  { %v329_v19 = vpop.permute.xlu1 %328  ;;  %v327_v24 = vpop.permute.xlu0 %326 }
  0xcf   :  { %v339_v42 = vadd.f32 %v329_v19, %v307_v61  ;;  %v338_v22 = vadd.f32 %v327_v24, %v306_v62 }
  0xd1   :  { %v1388_v10 = vmul.f32 %v365_v25, %v338_v22  ;;  %v367_v32 = vmul.f32 %v365_v25, %v339_v42 }
  0xd2   :  { %v317_v18 = vpop.permute.xlu1 %316  ;;  %v315_v26 = vpop.permute.xlu0 %314 }
  0xd3   :  { %v375_v27 = vrot.slane %v1388_v10, 7  ;;  %v376_v54 = vrot.slane %v367_v32, 7  ;;  %v325_v7 = vmax.f32 %v293_v63, %v317_v18  ;;  %v324_v44 = vmax.f32 %v292_v43, %v315_v26  ;;  %v1066_v10 = vld [vmem:[%s1564_s2 + $0x8] sm:$0xff]   ;;  %v1592_v32 = vld [vmem:[#allocation5_spill] sm:$0xff] }
  0xd4   :  { %1007 = vmatprep.subr.bf16.mxu0 %v1066_v10 }
  0xd5   :  { %381 = vrot.lane.b32.xlu0 %v375_v27, %s1100_s12  ;;  %v377_v42 = vsel %vm374_vm11, %v375_v27, %v376_v54  ;;  %1008 = vmatpush3.bf16.msra.mxu0 %v1066_v10  ;;  %v359_v27 = vmul.f32 %v358_v30, %v1592_v32  ;;  %v1069_v10 = vld [vmem:[%s1565_s3 + $0x20] ss:$0 sps:$4 sm:$0xff] (%p79_p5)  }
  0xd6   :  { %v333_v49 = vpop.permute.xlu1 %332  ;;  %v331_v47 = vpop.permute.xlu0 %330  ;;  %1058 = vmatprep.subr.msk.bf16.mxu1 (%p79_p5), %vm657_vm13, %v1069_v10 }
  0xd7   :  { %v341_v58 = vadd.f32 %v333_v49, %v309_v37  ;;  %v340_v33 = vadd.f32 %v331_v47, %v308_v36  ;;  %v1067_v36 = vld [vmem:[%s1564_s2] sm:$0xff]  }
  0xd8   :  { %1009 = vmatprep.subr.bf16.mxu0 %v1067_v36 }
  0xd9   :  { %v369_v4 = vmul.f32 %v365_v25, %v341_v58  ;;  %v368_v60 = vmul.f32 %v365_v25, %v340_v33  ;;  %385 = vrot.lane.b32.xlu0 %v376_v54, %s1100_s12  ;;  %1010 = vmatpush3.bf16.msra.mxu0 %v1067_v36  ;;  %v364_v54 = vmul.f32 %v358_v30, %v1595_v53 }
  0xda   :  { %v345_v21 = vpop.permute.xlu1 %344  ;;  %v343_v16 = vpop.permute.xlu0 %342  ;;  %1057 = vmatprep.subr.msk.bf16.mxu0 (%p79_p5), %vm657_vm13, %v1068_v9 }
  0xdb   :  { %v379_v12 = vrot.slane %v369_v4, 7  ;;  %v378_v56 = vrot.slane %v368_v60, 7  ;;  %v355_v55 = vmax.f32 %v323_v34, %v345_v21  ;;  %v354_v51 = vmax.f32 %v322_v1, %v343_v16 }
  0xdd   :  { %v407_v57 = vmul.f32 %v405_v20, %v355_v55  ;;  %v406_v59 = vmul.f32 %v405_v20, %v354_v51  ;;  %387 = vrot.lane.b32.xlu1 %v378_v56, %s1100_s12  ;;  %v380_v8 = vsel %vm374_vm11, %v378_v56, %v379_v12 }
  0xde   :  { %v349_v61 = vpop.permute.xlu1 %348  ;;  %389 = vrot.lane.b32.xlu0 %v380_v8, %s1100_s12  ;;  %v347_v62 = vpop.permute.xlu0 %346 }
  0xdf   :  { %v415_v25 = vrot.slane %v407_v57, 7  ;;  %v414_v11 = vrot.slane %v406_v59, 7  ;;  %v357_v13 = vmax.f32 %v325_v7, %v349_v61  ;;  %v356_v14 = vmax.f32 %v324_v44, %v347_v62 }
  0xe1   :  { %v409_v15 = vmul.f32 %v405_v20, %v357_v13  ;;  %v408_v19 = vmul.f32 %v405_v20, %v356_v14  ;;  %391 = vrot.lane.b32.xlu1 %v379_v12, %s1100_s12  ;;  %v416_v24 = vsel %vm374_vm11, %v414_v11, %v415_v25  ;;  %v930_v13 = vld [vmem:[%s1566_s4] ss:$0 sm:$0xff] }
  0xe2   :  { %424 = vrot.lane.b32.xlu0 %v415_v25, %s1100_s12 }
  0xe3   :  { %v418_v41 = vrot.slane %v409_v15, 7  ;;  %v417_v50 = vrot.slane %v408_v19, 7 }
  0xe5   :  { %383 = vrot.lane.b32.xlu1 %v377_v42, %s1100_s12  ;;  %v419_v22 = vsel %vm374_vm11, %v417_v50, %v418_v41 }
  0xe6   :  { %420 = vrot.lane.b32.xlu0 %v414_v11, %s1100_s12 }
  0xe9   :  { %426 = vrot.lane.b32.xlu1 %v417_v50, %s1100_s12 }
  0xea   :  { %428 = vrot.lane.b32.xlu0 %v419_v22, %s1100_s12 }
  0xed   :  { %422 = vrot.lane.b32.xlu1 %v416_v24, %s1100_s12 }
  0xf1   :  { %430 = vrot.lane.b32.xlu1 %v418_v41, %s1100_s12 }
 0x147   :  { %v382_v6 = vpop.permute.xlu0 %381 }
 0x148   :  { %v399_v49 = vadd.f32 %v382_v6, %v359_v27  ;;  %v659_v6 = vsel (%p79_p5), %vm657_vm13, %v1068_v9, 0  ;;  %v1598_v27 = vld [vmem:[#allocation7_spill] sm:$0xff] (%p79_p5) }
 0x149   :  { %v589_v28 = vmax.f32 (%p79_p5), %v1598_v27, 0.0 }
 0x14b   :  { %v386_v23 = vpop.permute.xlu0 %385  ;;  %v600_v39 = vrot.slane (%p79_p5), %v589_v28, 1 }
 0x14c   :  { %v401_v47 = vadd.f32 %v386_v23, %v361_v35  ;;  %v1071_v23 = vld [vmem:[%s1565_s3 + $0x18] sm:$0xff] (%p79_p5)   ;;  %v1074_v35 = vld [vmem:[%s1565_s3 + $0x2c] sm:$0xff] (%p79_p5)  }
 0x14f   :  { %v388_v17 = vpop.permute.xlu1 %387 }
 0x150   :  { %v390_v29 = vpop.permute.xlu0 %389  ;;  %v402_v52 = vadd.f32 %v388_v17, %v362_v46  ;;  %v744_v17 = vsel (%p79_p5), %vm657_vm13, %v1069_v10, 0  ;;  %v1075_v46 = vld [vmem:[%s1565_s3 + $0x8] sm:$0xff] (%p79_p5)  }
 0x151   :  { %v403_v33 = vadd.f32 %v390_v29, %v363_v38  ;;  %v1072_v29 = vld [vmem:[%s1565_s3 + $0x34] sm:$0xff] (%p79_p5)   ;;  %1030 = vmatpush3.bf16.msra.mxu1 (%p79_p5), %v744_v17 }
 0x152   :  { %1031 = vmatprep.subr.bf16.mxu1 (%p79_p5), %v1071_v23 }
 0x153   :  { %v392_v18 = vpop.permute.xlu1 %391 }
 0x154   :  { %v425_v26 = vpop.permute.xlu0 %424  ;;  %v404_v43 = vadd.f32 %v392_v18, %v364_v54  ;;  %v1073_v18 = vld [vmem:[%s1565_s3 + $0x10] sm:$0xff] (%p79_p5)   ;;  %v1076_v54 = vld [vmem:[%s1565_s3 + $0x24] sm:$0xff] (%p79_p5)  }
 0x155   :  { %v440_v34 = vadd.f32 %v425_v26, %v401_v47  ;;  %v1596_v26 = vld [vmem:[#allocation5_spill] sm:$0xff] (%p79_p5)  ;;  %1032 = vmatpush3.bf16.msra.mxu1 (%p79_p5), %v1071_v23 }
 0x156   :  { %v574_v30 = vmax.f32 (%p79_p5), %v1596_v26, 0.0  ;;  %1033 = vmatprep.subr.bf16.mxu1 (%p79_p5), %v1073_v18 }
 0x157   :  { %v384_v31 = vpop.permute.xlu1 %383  ;;  %v453_v20 = vrot.slane %v440_v34, 1 }
 0x158   :  { %v421_v37 = vpop.permute.xlu0 %420  ;;  %v400_v1 = vadd.f32 %v384_v31, %v360_v48  ;;  %v1597_v31 = vld [vmem:[#allocation6_spill] sm:$0xff] (%p79_p5)  ;;  %v576_v48 = vmax.f32 (%p79_p5), %v1137_v0, 0.0  ;;  %v1077_v0 = vld [vmem:[%s1565_s3] sm:$0xff] (%p79_p5)  }
 0x159   :  { %v438_v4 = vadd.f32 %v421_v37, %v399_v49  ;;  %v575_v32 = vmax.f32 (%p79_p5), %v1597_v31, 0.0  ;;  %v597_v37 = vrot.slane (%p79_p5), %v574_v30, 1  ;;  %v1599_v49 = vld [vmem:[#allocation8_spill] sm:$0xff] (%p79_p5)  ;;  %1034 = vmatpush3.bf16.msra.mxu1 (%p79_p5), %v1073_v18 }
 0x15a   :  { %v590_v47 = vmax.f32 (%p79_p5), %v1599_v49, 0.0  ;;  %1035 = vmatprep.subr.bf16.mxu1 (%p79_p5), %v1075_v46 }
 0x15b   :  { %v427_v40 = vpop.permute.xlu1 %426  ;;  %v450_v21 = vrot.slane %v438_v4, 1  ;;  %v578_v36 = vpack.c.bf16 (%p79_p5), %v575_v32, %v574_v30  ;;  %v598_v38 = vrot.slane (%p79_p5), %v575_v32, 1 }
 0x15c   :  { %v429_v58 = vpop.permute.xlu0 %428  ;;  %v441_v60 = vadd.f32 %v427_v40, %v402_v52  ;;  %v577_v40 = vmax.f32 (%p79_p5), %v1151_v3, 0.0  ;;  %v798_v3 = vrot.slane (%p79_p5), %v589_v28, 2 }
 0x15d   :  { %v442_v63 = vadd.f32 %v429_v58, %v403_v33  ;;  %1039 = vmatprep.mubr.msk.bf16.mxu1 (%p79_p5), %vm650_vm14, %v578_v36  ;;  %v599_v52 = vsel (%p79_p5), %vm154_vm8, %v597_v37, %v598_v38  ;;  %v601_v53 = vsel (%p79_p5), %vm154_vm8, %v598_v38, %v600_v39  ;;  %v602_v33 = vrot.slane (%p79_p5), %v576_v48, 1  ;;  %1036 = vmatpush3.bf16.msra.mxu1 (%p79_p5), %v1075_v46 }
 0x15e   :  { %v455_v12 = vrot.slane %v441_v60, 1  ;;  %v611_v58 = vpack.c.bf16 (%p79_p5), %v601_v53, %v599_v52  ;;  %v603_v34 = vrot.slane (%p79_p5), %v577_v40, 1  ;;  %1037 = vmatprep.subr.bf16.mxu1 (%p79_p5), %v1077_v0 }
 0x15f   :  { %v423_v45 = vpop.permute.xlu1 %422  ;;  %v456_v55 = vrot.slane %v442_v63, 1  ;;  %v796_v63 = vrot.slane (%p79_p5), %v575_v32, 2 }
 0x160   :  { %v439_v2 = vadd.f32 %v423_v45, %v400_v1  ;;  %v605_v1 = vrot.slane (%p79_p5), %v590_v47, 1  ;;  %v604_v4 = vsel (%p79_p5), %vm154_vm8, %v602_v33, %v603_v34  ;;  %v795_v45 = vrot.slane (%p79_p5), %v574_v30, 2 }
 0x161   :  { %v457_v8 = vsel %vm154_vm8, %v455_v12, %v456_v55  ;;  %1038 = vmatpush3.bf16.msra.mxu1 (%p79_p5), %v1077_v0 }
 0x162   :  { %v451_v16 = vrot.slane %v439_v2, 1  ;;  %v606_v60 = vsel (%p79_p5), %vm154_vm8, %v603_v34, %v605_v1  ;;  %v1078_v2 = vld [vmem:[%s1565_s3 + $0x68] ss:$0 sps:$4 sm:$0xff] (%p79_p5)  }
 0x163   :  { %v431_v56 = vpop.permute.xlu1 %430  ;;  %v855_v12 = vsel (%p79_p5), %vm657_vm13, %v1078_v2, 0 }
 0x164   :  { %v443_v51 = vadd.f32 %v431_v56, %v404_v43  ;;  %v452_v7 = vsel %vm154_vm8, %v450_v21, %v451_v16  ;;  %v454_v44 = vsel %vm154_vm8, %v451_v16, %v453_v20  ;;  %v797_v43 = vsel (%p79_p5), %vm257_vm10, %v795_v45, %v796_v63  ;;  %v1079_v56 = vld [vmem:[%s1565_s3 + $0x60] sm:$0xff] (%p79_p5)  }
 0x165   :  { %v464_v57 = vpack.c.bf16 %v454_v44, %v452_v7  ;;  %v799_v20 = vsel (%p79_p5), %vm257_vm10, %v796_v63, %v798_v3  ;;  %v612_v21 = vpack.c.bf16 (%p79_p5), %v606_v60, %v604_v4  ;;  %v579_v16 = vpack.c.bf16 (%p79_p5), %v577_v40, %v576_v48  ;;  %v1081_v7 = vld [vmem:[%s1565_s3 + $0x50] sm:$0xff] (%p79_p5)  }
 0x166   :  { %v458_v59 = vrot.slane %v443_v51, 1  ;;  %v1080_v51 = vld [vmem:[%s1565_s3 + $0x58] sm:$0xff] (%p79_p5)   ;;  %v803_v44 = vrot.slane (%p79_p5), %v590_v47, 2 }
 0x167   :  { %483 = vrot.lane.b32.xlu0 %v464_v57, %s1098_s26  ;;  %1040 = vmatmul.mubr.msk.bf16.vlgmr.msra.gmra.mxu1 (%p79_p5), %vm650_vm14, %v579_v16  ;;  %v800_v57 = vrot.slane (%p79_p5), %v576_v48, 2 }
 0x168   :  { %v459_v61 = vsel %vm154_vm8, %v456_v55, %v458_v59  ;;  %v809_v55 = vpack.c.bf16 (%p79_p5), %v799_v20, %v797_v43  ;;  %v801_v59 = vrot.slane (%p79_p5), %v577_v40, 2 }
 0x169   :  { %v465_v62 = vpack.c.bf16 %v459_v61, %v457_v8  ;;  %v1082_v8 = vld [vmem:[%s1565_s3 + $0x48] sm:$0xff] (%p79_p5)  }
 0x16a   :  { %v802_v61 = vsel (%p79_p5), %vm257_vm10, %v800_v57, %v801_v59 }
 0x16b   :  { %485 = vrot.lane.b32.xlu1 %v465_v62, %s1098_s26  ;;  %v804_v62 = vsel (%p79_p5), %vm257_vm10, %v801_v59, %v803_v44 }
 0x1d9   :  { %v484_v25 = vpop.permute.xlu0 %483 }
 0x1da   :  { %1011 = vmatprep.mubr.msk.bf16.mxu0 %vm511_vm12, %v484_v25  ;;  %v810_v25 = vpack.c.bf16 (%p79_p5), %v804_v62, %v802_v61 }
 0x1dd   :  { %v486_v11 = vpop.permute.xlu1 %485 }
 0x1de   :  { %1012 = vmatmul.mubr.msk.bf16.vlgmr.msra.gmra.mxu0 %vm511_vm12, %v486_v11 }
 0x1df   :  { %1016 = vmatpush3.bf16.msra.mxu0 (%p79_p5), %v659_v6  ;;  %1025 = vmatprep.mubr.msk.bf16.mxu0 (%p79_p5), %vm650_vm14, %v611_v58 }
 0x1e0   :  { %1017 = vmatprep.subr.bf16.mxu0 (%p79_p5), %v1070_v5 }
 0x1e3   :  { %1018 = vmatpush3.bf16.msra.mxu0 (%p79_p5), %v1070_v5 }
 0x1e4   :  { %1019 = vmatprep.subr.bf16.mxu0 (%p79_p5), %v1072_v29 }
 0x1e7   :  { %1020 = vmatpush3.bf16.msra.mxu0 (%p79_p5), %v1072_v29 }
 0x1e8   :  { %1021 = vmatprep.subr.bf16.mxu0 (%p79_p5), %v1074_v35 }
 0x1eb   :  { %1022 = vmatpush3.bf16.msra.mxu0 (%p79_p5), %v1074_v35 }
 0x1ec   :  { %1023 = vmatprep.subr.bf16.mxu0 (%p79_p5), %v1076_v54 }
 0x1ef   :  { %1024 = vmatpush3.bf16.msra.mxu0 (%p79_p5), %v1076_v54 }
 0x1f0   :  { %1059 = vmatprep.subr.msk.bf16.mxu0 (%p79_p5), %vm657_vm13, %v1078_v2 }
 0x1f2   :  { %1026 = vmatmul.mubr.msk.bf16.vlgmr.msra.gmra.mxu0 (%p79_p5), %vm650_vm14, %v612_v21 }
 0x1f3   :  { %1044 = vmatpush3.bf16.msra.mxu0 (%p79_p5), %v855_v12  ;;  %1053 = vmatprep.mubr.msk.bf16.mxu0 (%p79_p5), %vm650_vm14, %v809_v55 }
 0x1f4   :  { %1045 = vmatprep.subr.bf16.mxu0 (%p79_p5), %v1079_v56 }
 0x1f7   :  { %1046 = vmatpush3.bf16.msra.mxu0 (%p79_p5), %v1079_v56 }
 0x1f8   :  { %1047 = vmatprep.subr.bf16.mxu0 (%p79_p5), %v1080_v51 }
 0x1fb   :  { %1048 = vmatpush3.bf16.msra.mxu0 (%p79_p5), %v1080_v51 }
 0x1fc   :  { %1049 = vmatprep.subr.bf16.mxu0 (%p79_p5), %v1081_v7 }
 0x1ff   :  { %1050 = vmatpush3.bf16.msra.mxu0 (%p79_p5), %v1081_v7 }
 0x200   :  { %1051 = vmatprep.subr.bf16.mxu0 (%p79_p5), %v1082_v8 }
 0x203   :  { %1052 = vmatpush3.bf16.msra.mxu0 (%p79_p5), %v1082_v8 }
 0x206   :  { %1054 = vmatmul.mubr.msk.bf16.vlgmr.msra.gmra.mxu0 (%p79_p5), %vm650_vm14, %v810_v25 }
 0x29e   :  { %v1013_v14 = vpop.f32.mrf.mxu0 }
 0x29f   :  { %v561_v15 = vadd.f32 %v1013_v14, %v930_v13 }
 0x2a0   :  { %v552_v19 = vpop.f32.mrf.mxu0 }
 0x2a1   :  { %569 = vst [vmem:[%s1567_s5 + $0x10] sm:$0xff] %v561_v15  ;;  %v553_v24 = vadd.f32 %v930_v13, %v552_v19 }
 0x2a2   :  { %v1014_v41 = vpop.f32.mrf.mxu0 }
 0x2a3   :  { %567 = vst [vmem:[%s1567_s5] sm:$0xff] %v553_v24  ;;  %v564_v50 = vadd.f32 %v1014_v41, %v930_v13  ;;  %573 = sbr.rel (!%p79_p5) target bundleno = 722 (0x2d2), region = 29 }
 0x2a4   :  { %v555_v42 = vpop.f32.mrf.mxu0 }
 0x2a5   :  { %570 = vst [vmem:[%s1567_s5 + $0x18] sm:$0xff] %v564_v50  ;;  %v556_v22 = vadd.f32 %v930_v13, %v555_v42  ;;  %v1041_v13 = vpop.f32.mrf.mxu1 (%p79_p5) }
 0x2a7   :  { %568 = vst [vmem:[%s1567_s5 + $0x8] sm:$0xff] %v556_v22  ;;  %v780_v15 = vpop.f32.mrf.mxu1 (%p79_p5) }
 0x2a8   :  { %v912_v22 = vld [vmem:[%s1567_s5 + $0x10] sm:$0xff] }
 0x2a9   :  { %v1042_v24 = vpop.f32.mrf.mxu1 }
 0x2aa   :  { %v910_v23 = vld [vmem:[%s1567_s5] sm:$0xff] }
 0x2ab   :  { %v783_v10 = vpop.f32.mrf.mxu1 }
 0x2ac   :  { %v913_v30 = vld [vmem:[%s1567_s5 + $0x18] sm:$0xff] }
 0x2ae   :  { %v911_v35 = vld [vmem:[%s1567_s5 + $0x8] sm:$0xff] }
 0x2b2   :  { %v1027_v11 = vpop.f32.mrf.mxu0 }
 0x2b3   :  { %v789_v50 = vadd.f32 %v1041_v13, %v1027_v11 }
 0x2b4   :  { %v695_v14 = vpop.f32.mrf.mxu0 }
 0x2b5   :  { %v781_v9 = vadd.f32 %v780_v15, %v695_v14 }
 0x2b6   :  { %v1028_v19 = vpop.f32.mrf.mxu0 }
 0x2b7   :  { %v792_v17 = vadd.f32 %v1042_v24, %v1028_v19 }
 0x2b8   :  { %v698_v41 = vpop.f32.mrf.mxu0 }
 0x2b9   :  { %v784_v31 = vadd.f32 %v783_v10, %v698_v41 }
 0x2c6   :  { %v1055_v42 = vpop.f32.mrf.mxu0 }
 0x2c7   :  { %v908_v5 = vadd.f32 %v1055_v42, %v789_v50 }
 0x2c8   :  { %v891_v6 = vpop.f32.mrf.mxu0 }
 0x2c9   :  { %v916_v29 = vadd.f32 %v912_v22, %v908_v5  ;;  %v906_v18 = vadd.f32 %v891_v6, %v781_v9 }
 0x2ca   :  { %v1056_v26 = vpop.f32.mrf.mxu0 }
 0x2cb   :  { %920 = vst [vmem:[%s1567_s5 + $0x10] sm:$0xff] %v916_v29  ;;  %v914_v32 = vadd.f32 %v910_v23, %v906_v18  ;;  %v909_v27 = vadd.f32 %v1056_v26, %v792_v17 }
 0x2cc   :  { %v894_v28 = vpop.f32.mrf.mxu0 }
 0x2cd   :  { %918 = vst [vmem:[%s1567_s5] sm:$0xff] %v914_v32  ;;  %v917_v37 = vadd.f32 %v913_v30, %v909_v27  ;;  %v907_v36 = vadd.f32 %v894_v28, %v784_v31 }
 0x2cf   :  { %921 = vst [vmem:[%s1567_s5 + $0x18] sm:$0xff] %v917_v37  ;;  %v915_v46 = vadd.f32 %v911_v35, %v907_v36 }
 0x2d1   :  { %919 = vst [vmem:[%s1567_s5 + $0x8] sm:$0xff] %v915_v46 }
 0x2d2 PF:  { %926 = vsyncpa [#allocation3], 1 }

</bundles_post_ra>
